<compile_context>
chip_gen: v6e
topology: v6e:2x2x1
jax: 0.10.0
libtpu: 0.0.40
codegen_flags: <defaults>
</compile_context>

<pallas_src>
import functools

import numpy as np
import jax
import jax.numpy as jnp
from jax.experimental import pallas as pl
from jax.experimental.pallas import tpu as pltpu


def _csg_kernel(pts_ref, q_ref, coef_ref, o_ref, *scratch, depth, use_mxu):
    # pts_ref:  (3, tile)        x / y / z rows of the sample points
    # q_ref:    (M, 10|16)       sharpness-scaled quadric coefficients
    #                            (zero-padded to 16 columns on the MXU path)
    # coef_ref: (M, 3*depth)     per-level boolean coefficients (a, b, c),
    #                            node j of level ii at sublane j * 2**(ii+1)
    # o_ref:    (1, tile)        CSG root value per point (lane-dense)
    # scratch:  () or (mono_ref,) with mono_ref: (16, tile) VMEM monomial slab
    M = 1 << depth
    pts = pts_ref[...]                            # (3, tile)
    x = pts[0:1, :]
    y = pts[1:2, :]
    z = pts[2:3, :]

    if use_mxu:
        # Quadric level set on the MXU: lv = q @ monomials.
        (mono_ref,) = scratch
        tile = x.shape[1]
        mono_ref[0:3, :] = pts * pts              # x^2, y^2, z^2
        mono_ref[3:4, :] = x * y
        mono_ref[4:5, :] = y * z
        mono_ref[5:6, :] = z * x
        mono_ref[6:9, :] = pts                    # x, y, z
        mono_ref[9:10, :] = jnp.ones_like(x)      # constant term
        # Pad rows (match the zero-padded q columns); rewritten every step so
        # the scratch is never read uninitialized on any core.
        mono_ref[10:16, :] = jnp.zeros((6, tile), jnp.float32)
        lv = jnp.dot(q_ref[...], mono_ref[...],
                     preferred_element_type=jnp.float32)      # (M, tile)
    else:
        # Horner-factored quadric level set on the VPU (sharpness pre-folded).
        q = q_ref[...]                            # (M, 10)

        def col(j):
            return q[:, j:j + 1]                  # (M, 1), broadcast on lanes

        lv = (x * (col(0) * x + col(3) * y + col(6))
              + y * (col(1) * y + col(4) * z + col(7))
              + z * (col(2) * z + col(5) * x + col(8))
              + col(9))                           # (M, tile)

    # activation(v) = sigmoid(-v) = 1 / (1 + exp(v)); exp + approx reciprocal
    # both issue on the EUP slot.  Clamp so exp can never overflow to inf and
    # feed NaN into the approximate reciprocal (clamped tail -> ~1e-26 ~ 0).
    lv = jnp.minimum(lv, 60.0)
    s = pl.reciprocal(1.0 + jnp.exp(lv), approx=True)

    coef = coef_ref[...]                          # (M, 3*depth)

    # Binary-tree soft boolean reduction over sublanes (statically unrolled).
    for ii in range(depth):
        k = 1 << ii
        if M >= 8:
            # XLU sublane rotate; shift = M - k (non-negative) == roll by -k
            # under circular semantics, so wraps still land on zero coefs.
            partner = pltpu.roll(s, shift=M - k, axis=0)
        else:
            partner = jnp.roll(s, shift=-k, axis=0)
        a = coef[:, 3 * ii + 0:3 * ii + 1]        # (M, 1)
        b = coef[:, 3 * ii + 1:3 * ii + 2]
        c = coef[:, 3 * ii + 2:3 * ii + 3]
        # 3 mul + 2 add (was 4 mul + 2 add): s = a*s + b*p + c*s*p
        s = s * (a + c * partner) + b * partner

    o_ref[...] = s[0:1, :]                        # lane-dense root row


def _round_up(v, m):
    return ((v + m - 1) // m) * m


def _has_multiple_tensorcores():
    # v7x exposes 2 TensorCores per chip; splitting small problems into >= 2
    # grid steps only pays off there.  Single-TC v5e/v6e skip the split.
    try:
        kind = jax.devices()[0].device_kind.lower()
    except Exception:
        return False
    return ("v7" in kind) or ("7x" in kind)


def _auto_tile(M, N, multi_tc):
    npad128 = _round_up(max(N, 1), 128)
    # Big lane-dense tiles to amortize per-grid-step overhead, capped so the
    # (M, tile) f32 temporaries stay ~512 KiB each (cheap VMEM round-trips).
    tile = max(1024, min(32768, ((131072 // M) // 128) * 128))
    tile = min(tile, npad128)
    if multi_tc and npad128 >= 256:
        # Guarantee >= 2 grid steps so both TensorCores get work.
        tile = min(tile, _round_up((N + 1) // 2, 128))
    return tile


def _csg_forward_impl(pts, primitive_params, boolean_params, sharpness_params,
                      depth, max_temperature, boolean_frequency, tile, N):
    """Core implementation; pts is SoA (3, N) float32."""
    f32 = jnp.float32
    M = 1 << depth
    assert primitive_params.shape == (M, 10)

    # --- per-node boolean mixing coefficients (pure jnp: jit/grad friendly) --
    bw = jax.nn.softmax(
        jnp.sin(boolean_frequency * boolean_params.astype(f32)) * max_temperature,
        axis=1)                                              # (M-1, 4)
    a_all = bw[:, 1] + bw[:, 2]
    b_all = bw[:, 1] + bw[:, 3]
    c_all = bw[:, 0] - bw[:, 1] - bw[:, 2] - bw[:, 3]

    # Scatter (a, b, c) of node j, level ii to sublane j * 2**(ii+1).
    # Indices are static numpy; values stay traced jnp.
    coef = jnp.zeros((M, 3 * depth), f32)
    cur = 0
    for ii in range(depth):
        nodes = M >> (ii + 1)
        rows = np.arange(nodes) * (1 << (ii + 1))
        coef = coef.at[rows, 3 * ii + 0].set(a_all[cur:cur + nodes])
        coef = coef.at[rows, 3 * ii + 1].set(b_all[cur:cur + nodes])
        coef = coef.at[rows, 3 * ii + 2].set(c_all[cur:cur + nodes])
        cur += nodes

    # Fold sharpness into the quadric coefficients (tiny (M, 10) multiply).
    q_scaled = primitive_params.astype(f32) * sharpness_params.astype(f32)[:, None]

    use_mxu = M >= 16                       # MXU quadric is a clear win at M>=16
    if use_mxu:
        q_scaled = jnp.pad(q_scaled, ((0, 0), (0, 6)))        # (M, 16)

    # --- tiling: points on the lane axis, lane-dense blocks ------------------
    multi_tc = _has_multiple_tensorcores()
    if tile is None:
        tile_ = _auto_tile(M, N, multi_tc)
    else:
        tile_ = max(128, (int(tile) // 128) * 128)
        tile_ = min(tile_, _round_up(N, 128))
    Npad = _round_up(N, tile_)
    if Npad != pts.shape[1]:
        pts = jnp.pad(pts, ((0, 0), (0, Npad - pts.shape[1])))

    kernel = functools.partial(_csg_kernel, depth=depth, use_mxu=use_mxu)
    scratch_shapes = [pltpu.VMEM((16, tile_), f32)] if use_mxu else []

    # VMEM budget (worst defaults): blocks 2*(3+1)*tile*4B <= 1 MiB, monomial
    # scratch 16*tile*4B <= 2 MiB, (M,tile) temporaries a few MiB -- comfortably
    # inside the 32 MiB scoped default on v7x/v6e/v5e, so no vmem_limit_bytes.
    out = pl.pallas_call(
        kernel,
        out_shape=jax.ShapeDtypeStruct((1, Npad), f32),
        grid_spec=pltpu.PrefetchScalarGridSpec(
            num_scalar_prefetch=0,
            grid=(Npad // tile_,),
            in_specs=[
                pl.BlockSpec((3, tile_), lambda i: (0, i)),
                pl.BlockSpec(q_scaled.shape, lambda i: (0, 0)),
                pl.BlockSpec((M, 3 * depth), lambda i: (0, 0)),
            ],
            out_specs=pl.BlockSpec((1, tile_), lambda i: (0, i)),
            scratch_shapes=scratch_shapes,
        ),
        compiler_params=pltpu.CompilerParams(
            dimension_semantics=("parallel",)),
    )(pts, q_scaled, coef)

    return out[0, :N]


@functools.partial(
    jax.jit,
    static_argnames=("depth", "max_temperature", "boolean_frequency", "tile"))
def csg_net_forward(p, primitive_params, boolean_params, sharpness_params,
                    depth, max_temperature=1000, boolean_frequency=10,
                    tile=None):
    """Forward pass for (b, P, 3) AoS points; returns (b, P)."""
    b, P, dim = p.shape
    assert dim == 3
    N = b * P
    # AoS -> SoA: one fused transpose copy under jit.  Callers that keep their
    # points in SoA (3, N) should use csg_net_forward_soa to skip this pass.
    pts = p.reshape(N, dim).astype(jnp.float32).T             # (3, N)
    out = _csg_forward_impl(pts, primitive_params, boolean_params,
                            sharpness_params, depth, max_temperature,
                            boolean_frequency, tile, N)
    return out.reshape(b, P)


@functools.partial(
    jax.jit,
    static_argnames=("depth", "max_temperature", "boolean_frequency", "tile"))
def csg_net_forward_soa(pts, primitive_params, boolean_params, sharpness_params,
                        depth, max_temperature=1000, boolean_frequency=10,
                        tile=None):
    """Same forward, points already in SoA (3, N) layout; returns (N,).
    Avoids the extra HBM round trip of the AoS->SoA transpose."""
    dim, N = pts.shape
    assert dim == 3
    return _csg_forward_impl(pts.astype(jnp.float32), primitive_params,
                             boolean_params, sharpness_params, depth,
                             max_temperature, boolean_frequency, tile, N)


def csg_net_reference(p, primitive_params, boolean_params, sharpness_params,
                      depth, max_temperature=1000, boolean_frequency=10):
    """Pure-JAX mirror of the PyTorch forward (for verification)."""
    x = p[:, :, 0:1]
    y = p[:, :, 1:2]
    z = p[:, :, 2:3]

    def Q(j):
        return primitive_params[:, j][None, None, :]

    lv = (Q(0) * x ** 2 + Q(1) * y ** 2 + Q(2) * z ** 2 + Q(3) * x * y
          + Q(4) * y * z + Q(5) * z * x + Q(6) * x + Q(7) * y + Q(8) * z + Q(9))
    lv = sharpness_params[None, None, :] * lv
    s = jax.nn.sigmoid(-lv)
    cur = 0
    for _ in range(depth):
        sl = s[:, :, ::2]
        sr = s[:, :, 1::2]
        n = sr.shape[2]
        bp = boolean_params[cur:cur + n]
        cur += n
        bw = jax.nn.softmax(jnp.sin(boolean_frequency * bp) * max_temperature, axis=1)
        c0, c1, c2, c3 = bw[:, 0], bw[:, 1], bw[:, 2], bw[:, 3]
        s = (c1 + c2) * sl + (c1 + c3) * sr + (c0 - c1 - c2 - c3) * sl * sr
    return s[:, :, 0]


if __name__ == "__main__":
    b = 2
    # (depth, P, tile): depth 3 exercises the Horner/VALU path (M=8),
    # the explicit tile=256 case exercises a multi-step grid, and depth 5
    # (M=32) exercises the MXU monomial path and multi-tile sublane rolls.
    cases = ((3, 128, None), (3, 512, 256), (5, 128, None))
    for depth, P, tile in cases:
        M = 2 ** depth
        key = jax.random.PRNGKey(0)
        k1, k2, k3, k4 = jax.random.split(key, 4)
        primitive_params = jax.random.uniform(k1, (M, 10), jnp.float32, -0.5, 0.5)
        boolean_params = jax.random.uniform(k2, (M - 1, 4), jnp.float32, -0.5, 0.5)
        sharpness_params = jax.random.uniform(k3, (M,), jnp.float32, 0.5, 1.5)
        p = jax.random.uniform(k4, (b, P, 3), jnp.float32, -1.0, 1.0)

        out = csg_net_forward(p, primitive_params, boolean_params,
                              sharpness_params, depth, tile=tile)
        out = jax.block_until_ready(out)
        assert out.shape == (b, P)

        ref = csg_net_reference(p, primitive_params, boolean_params,
                                sharpness_params, depth)
        # Tolerance accounts for the EUP approximate reciprocal in the
        # kernel's sigmoid; its per-leaf error compounds additively over the
        # 2**depth leaves, hence the looser bound at depth 5.  Still tight
        # enough to catch any layout / scatter / matmul bug.
        tol = 5e-3 if depth <= 3 else 1.5e-2
        np.testing.assert_allclose(np.asarray(out), np.asarray(ref),
                                   rtol=tol, atol=tol)

    print("KERNEL_OK")
</pallas_src>

<mosaic_0001>
module attributes {stable_mosaic.version = 11 : i64} {
  func.func @_csg_kernel(%arg0: i32, %arg1: memref<3x256xf32, #tpu.memory_space<vmem>>, %arg2: memref<8x10xf32, #tpu.memory_space<vmem>>, %arg3: memref<8x9xf32, #tpu.memory_space<vmem>>, %arg4: memref<1x256xf32, #tpu.memory_space<vmem>>) attributes {dimension_semantics = [#tpu.dimension_semantics<parallel>], iteration_bounds = array<i64: 1>, scalar_prefetch = 0 : i64, scratch_operands = 0 : i64, tpu.core_type = #tpu.core_type<tc>, window_params = [{transform_indices = @transform_0, window_bounds = array<i64: 3, 256>}, {pipeline_mode = #tpu.pipeline_mode<synchronous>, transform_indices = @transform_1, window_bounds = array<i64: 8, 10>}, {pipeline_mode = #tpu.pipeline_mode<synchronous>, transform_indices = @transform_2, window_bounds = array<i64: 8, 9>}, {transform_indices = @transform_3, window_bounds = array<i64: 1, 256>}]} {
    %c0 = arith.constant 0 : index
    %c0_0 = arith.constant 0 : index
    %0 = vector.load %arg1[%c0, %c0_0] : memref<3x256xf32, #tpu.memory_space<vmem>>, vector<3x256xf32>
    %1 = vector.extract_strided_slice %0 {offsets = [0, 0], sizes = [1, 256], strides = [1, 1]} : vector<3x256xf32> to vector<1x256xf32>
    %2 = vector.extract_strided_slice %0 {offsets = [1, 0], sizes = [1, 256], strides = [1, 1]} : vector<3x256xf32> to vector<1x256xf32>
    %3 = vector.extract_strided_slice %0 {offsets = [2, 0], sizes = [1, 256], strides = [1, 1]} : vector<3x256xf32> to vector<1x256xf32>
    %c0_1 = arith.constant 0 : index
    %c0_2 = arith.constant 0 : index
    %4 = vector.load %arg2[%c0_1, %c0_2] : memref<8x10xf32, #tpu.memory_space<vmem>>, vector<8x10xf32>
    %5 = vector.extract_strided_slice %4 {offsets = [0, 0], sizes = [8, 1], strides = [1, 1]} : vector<8x10xf32> to vector<8x1xf32>
    %6 = vector.broadcast %5 : vector<8x1xf32> to vector<8x256xf32>
    %7 = vector.broadcast %1 : vector<1x256xf32> to vector<8x256xf32>
    %8 = arith.mulf %6, %7 : vector<8x256xf32>
    %9 = vector.extract_strided_slice %4 {offsets = [0, 3], sizes = [8, 1], strides = [1, 1]} : vector<8x10xf32> to vector<8x1xf32>
    %10 = vector.broadcast %9 : vector<8x1xf32> to vector<8x256xf32>
    %11 = vector.broadcast %2 : vector<1x256xf32> to vector<8x256xf32>
    %12 = arith.mulf %10, %11 : vector<8x256xf32>
    %13 = arith.addf %8, %12 : vector<8x256xf32>
    %14 = vector.extract_strided_slice %4 {offsets = [0, 6], sizes = [8, 1], strides = [1, 1]} : vector<8x10xf32> to vector<8x1xf32>
    %15 = vector.broadcast %14 : vector<8x1xf32> to vector<8x256xf32>
    %16 = arith.addf %13, %15 : vector<8x256xf32>
    %17 = vector.broadcast %1 : vector<1x256xf32> to vector<8x256xf32>
    %18 = arith.mulf %17, %16 : vector<8x256xf32>
    %19 = vector.extract_strided_slice %4 {offsets = [0, 1], sizes = [8, 1], strides = [1, 1]} : vector<8x10xf32> to vector<8x1xf32>
    %20 = vector.broadcast %19 : vector<8x1xf32> to vector<8x256xf32>
    %21 = vector.broadcast %2 : vector<1x256xf32> to vector<8x256xf32>
    %22 = arith.mulf %20, %21 : vector<8x256xf32>
    %23 = vector.extract_strided_slice %4 {offsets = [0, 4], sizes = [8, 1], strides = [1, 1]} : vector<8x10xf32> to vector<8x1xf32>
    %24 = vector.broadcast %23 : vector<8x1xf32> to vector<8x256xf32>
    %25 = vector.broadcast %3 : vector<1x256xf32> to vector<8x256xf32>
    %26 = arith.mulf %24, %25 : vector<8x256xf32>
    %27 = arith.addf %22, %26 : vector<8x256xf32>
    %28 = vector.extract_strided_slice %4 {offsets = [0, 7], sizes = [8, 1], strides = [1, 1]} : vector<8x10xf32> to vector<8x1xf32>
    %29 = vector.broadcast %28 : vector<8x1xf32> to vector<8x256xf32>
    %30 = arith.addf %27, %29 : vector<8x256xf32>
    %31 = vector.broadcast %2 : vector<1x256xf32> to vector<8x256xf32>
    %32 = arith.mulf %31, %30 : vector<8x256xf32>
    %33 = arith.addf %18, %32 : vector<8x256xf32>
    %34 = vector.extract_strided_slice %4 {offsets = [0, 2], sizes = [8, 1], strides = [1, 1]} : vector<8x10xf32> to vector<8x1xf32>
    %35 = vector.broadcast %34 : vector<8x1xf32> to vector<8x256xf32>
    %36 = vector.broadcast %3 : vector<1x256xf32> to vector<8x256xf32>
    %37 = arith.mulf %35, %36 : vector<8x256xf32>
    %38 = vector.extract_strided_slice %4 {offsets = [0, 5], sizes = [8, 1], strides = [1, 1]} : vector<8x10xf32> to vector<8x1xf32>
    %39 = vector.broadcast %38 : vector<8x1xf32> to vector<8x256xf32>
    %40 = vector.broadcast %1 : vector<1x256xf32> to vector<8x256xf32>
    %41 = arith.mulf %39, %40 : vector<8x256xf32>
    %42 = arith.addf %37, %41 : vector<8x256xf32>
    %43 = vector.extract_strided_slice %4 {offsets = [0, 8], sizes = [8, 1], strides = [1, 1]} : vector<8x10xf32> to vector<8x1xf32>
    %44 = vector.broadcast %43 : vector<8x1xf32> to vector<8x256xf32>
    %45 = arith.addf %42, %44 : vector<8x256xf32>
    %46 = vector.broadcast %3 : vector<1x256xf32> to vector<8x256xf32>
    %47 = arith.mulf %46, %45 : vector<8x256xf32>
    %48 = arith.addf %33, %47 : vector<8x256xf32>
    %49 = vector.extract_strided_slice %4 {offsets = [0, 9], sizes = [8, 1], strides = [1, 1]} : vector<8x10xf32> to vector<8x1xf32>
    %50 = vector.broadcast %49 : vector<8x1xf32> to vector<8x256xf32>
    %51 = arith.addf %48, %50 : vector<8x256xf32>
    %cst = arith.constant 6.000000e+01 : f32
    %52 = vector.broadcast %cst : f32 to vector<8x256xf32>
    %53 = arith.minimumf %51, %52 : vector<8x256xf32>
    %54 = math.exp %53 : vector<8x256xf32>
    %cst_3 = arith.constant 1.000000e+00 : f32
    %55 = vector.broadcast %cst_3 : f32 to vector<8x256xf32>
    %56 = arith.addf %55, %54 : vector<8x256xf32>
    %57 = tpu.reciprocal %56 {approx = true} : vector<8x256xf32> -> vector<8x256xf32>
    %c0_4 = arith.constant 0 : index
    %c0_5 = arith.constant 0 : index
    %58 = vector.load %arg3[%c0_4, %c0_5] : memref<8x9xf32, #tpu.memory_space<vmem>>, vector<8x9xf32>
    %c7_i32 = arith.constant 7 : i32
    %59 = tpu.dynamic_rotate %57 by %c7_i32 dim 0 : vector<8x256xf32>, i32 -> vector<8x256xf32>
    %60 = vector.extract_strided_slice %58 {offsets = [0, 0], sizes = [8, 1], strides = [1, 1]} : vector<8x9xf32> to vector<8x1xf32>
    %61 = vector.extract_strided_slice %58 {offsets = [0, 1], sizes = [8, 1], strides = [1, 1]} : vector<8x9xf32> to vector<8x1xf32>
    %62 = vector.extract_strided_slice %58 {offsets = [0, 2], sizes = [8, 1], strides = [1, 1]} : vector<8x9xf32> to vector<8x1xf32>
    %63 = vector.broadcast %62 : vector<8x1xf32> to vector<8x256xf32>
    %64 = arith.mulf %63, %59 : vector<8x256xf32>
    %65 = vector.broadcast %60 : vector<8x1xf32> to vector<8x256xf32>
    %66 = arith.addf %65, %64 : vector<8x256xf32>
    %67 = arith.mulf %57, %66 : vector<8x256xf32>
    %68 = vector.broadcast %61 : vector<8x1xf32> to vector<8x256xf32>
    %69 = arith.mulf %68, %59 : vector<8x256xf32>
    %70 = arith.addf %67, %69 : vector<8x256xf32>
    %c6_i32 = arith.constant 6 : i32
    %71 = tpu.dynamic_rotate %70 by %c6_i32 dim 0 : vector<8x256xf32>, i32 -> vector<8x256xf32>
    %72 = vector.extract_strided_slice %58 {offsets = [0, 3], sizes = [8, 1], strides = [1, 1]} : vector<8x9xf32> to vector<8x1xf32>
    %73 = vector.extract_strided_slice %58 {offsets = [0, 4], sizes = [8, 1], strides = [1, 1]} : vector<8x9xf32> to vector<8x1xf32>
    %74 = vector.extract_strided_slice %58 {offsets = [0, 5], sizes = [8, 1], strides = [1, 1]} : vector<8x9xf32> to vector<8x1xf32>
    %75 = vector.broadcast %74 : vector<8x1xf32> to vector<8x256xf32>
    %76 = arith.mulf %75, %71 : vector<8x256xf32>
    %77 = vector.broadcast %72 : vector<8x1xf32> to vector<8x256xf32>
    %78 = arith.addf %77, %76 : vector<8x256xf32>
    %79 = arith.mulf %70, %78 : vector<8x256xf32>
    %80 = vector.broadcast %73 : vector<8x1xf32> to vector<8x256xf32>
    %81 = arith.mulf %80, %71 : vector<8x256xf32>
    %82 = arith.addf %79, %81 : vector<8x256xf32>
    %c4_i32 = arith.constant 4 : i32
    %83 = tpu.dynamic_rotate %82 by %c4_i32 dim 0 : vector<8x256xf32>, i32 -> vector<8x256xf32>
    %84 = vector.extract_strided_slice %58 {offsets = [0, 6], sizes = [8, 1], strides = [1, 1]} : vector<8x9xf32> to vector<8x1xf32>
    %85 = vector.extract_strided_slice %58 {offsets = [0, 7], sizes = [8, 1], strides = [1, 1]} : vector<8x9xf32> to vector<8x1xf32>
    %86 = vector.extract_strided_slice %58 {offsets = [0, 8], sizes = [8, 1], strides = [1, 1]} : vector<8x9xf32> to vector<8x1xf32>
    %87 = vector.broadcast %86 : vector<8x1xf32> to vector<8x256xf32>
    %88 = arith.mulf %87, %83 : vector<8x256xf32>
    %89 = vector.broadcast %84 : vector<8x1xf32> to vector<8x256xf32>
    %90 = arith.addf %89, %88 : vector<8x256xf32>
    %91 = arith.mulf %82, %90 : vector<8x256xf32>
    %92 = vector.broadcast %85 : vector<8x1xf32> to vector<8x256xf32>
    %93 = arith.mulf %92, %83 : vector<8x256xf32>
    %94 = arith.addf %91, %93 : vector<8x256xf32>
    %95 = vector.extract_strided_slice %94 {offsets = [0, 0], sizes = [1, 256], strides = [1, 1]} : vector<8x256xf32> to vector<1x256xf32>
    %c0_6 = arith.constant 0 : index
    %c0_7 = arith.constant 0 : index
    %96 = vector.load %arg4[%c0_6, %c0_7] : memref<1x256xf32, #tpu.memory_space<vmem>>, vector<1x256xf32>
    tpu.vector_store %arg4[%c0_6, %c0_7], %95 {strides = array<i32>} : memref<1x256xf32, #tpu.memory_space<vmem>>, vector<1x256xf32>,
    return
  }
  func.func @transform_0(%arg0: i32) -> (i32, i32) {
    %c0_i32 = arith.constant 0 : i32
    %c0_i32_0 = arith.constant 0 : i32
    return %c0_i32, %arg0 : i32, i32
  }
  func.func @transform_1(%arg0: i32) -> (i32, i32) {
    %c0_i32 = arith.constant 0 : i32
    %c0_i32_0 = arith.constant 0 : i32
    %c0_i32_1 = arith.constant 0 : i32
    return %c0_i32, %c0_i32_0 : i32, i32
  }
  func.func @transform_2(%arg0: i32) -> (i32, i32) {
    %c0_i32 = arith.constant 0 : i32
    %c0_i32_0 = arith.constant 0 : i32
    %c0_i32_1 = arith.constant 0 : i32
    return %c0_i32, %c0_i32_0 : i32, i32
  }
  func.func @transform_3(%arg0: i32) -> (i32, i32) {
    %c0_i32 = arith.constant 0 : i32
    %c0_i32_0 = arith.constant 0 : i32
    return %c0_i32, %arg0 : i32, i32
  }
}

</mosaic_0001>

<bundles_post_ra>
// kernel: csg_net_forward.1
= control target key start
LH: loop header
LB: loop body
LE: loop exit
PB: predicated region body
PF: predicated region fallthrough
CT: control target
= control target key end

     0   :  { %v332_v1 = vmov 1   ;;  %v333_v2 = vmov 0   ;;  %s387_s0 = inlined_call_operand.vmem [shape: f32[3,256], index: 0, kind: input, shape index: {}]   ;;  %s388_s1 = inlined_call_operand.vmem [shape: f32[8,10], index: 1, kind: input, shape index: {}]   ;;  %s389_s2 = inlined_call_operand.vmem [shape: f32[8,9], index: 2, kind: input, shape index: {}]   ;;  %s390_s3 = inlined_call_operand.hbm [shape: f32[1,256], index: 3, kind: output, shape index: {}]  }
   0x1   :  { %v16_v0 = vld [vmem:[%s388_s1] sm:$0xff]  ;;  %284 = vset.pattern.permute.xlu1 %v332_v1  ;;  %282 = vset.pattern.permute.xlu0 %v333_v2 }
   0x2   :  { %78 = vperm.xlu1 %284, %v16_v0   ;;  %19 = vperm.xlu0 %282, %v16_v0  }
   0x3   :  { %8 = vsyncpa [#allocation3], 0  ;;  %v334_v3 = vmov 4   ;;  %v335_v4 = vmov 3   ;;  %v336_v5 = vmov 2   ;;  %v337_v6 = vmov 5  }
   0x4   :  { %v338_v7 = vmov 6   ;;  %v339_v8 = vmov 8   ;;  %v340_v9 = vmov 7   ;;  %v159_v10 = vld [vmem:[%s389_s2] sm:$0xff]  ;;  %v341_v11 = vmov 9  }
   0x5   :  { %v23_v12 = vlaneseq  ;;  %v15_v20 = vld [vmem:[%s387_s0] sm:$0x77]  ;;  %s343_s0 = smov [#allocation2]  }
   0x6   :  { %285 = vset.pattern.permute.xlu1 %v334_v3  ;;  %283 = vset.pattern.permute.xlu0 %v335_v4  ;;  %s262_s16 = sshll.u32 %s343_s0, 4  ;;  %s263_s16 = int_to_ptr.vmem [resolvable:$true] %s262_s16 }
   0x7   :  { %84 = vperm.xlu1 %285, %v16_v0   ;;  %44 = vperm.xlu0 %283, %v16_v0   ;;  %v371_v13 = vshrl.u32 %v23_v12, 7  ;;  %vm253_vm0 = vcmp.lt.s32.totalorder %v23_v12, 256  ;;  %s310_s17 = scalar_lea.vmem %s263_s16, 32  ;;  %p315_p1 = scmp.lt.s32.totalorder %s263_s16, %s263_s16 }
   0x8   :  { %p311_p0 = scmp.ne.s32.totalorder %s263_s16, %s310_s17  ;;  %p316_p2 = scmp.lt.s32.totalorder %s310_s17, %s310_s17 }
   0x9   :  { %v25_v15 = vsub.s32 0, %v371_v13  ;;  %v29_v16 = vsub.s32 4, %v371_v13  ;;  %v49_v18 = vsub.s32 1, %v371_v13  ;;  %v53_v19 = vsub.s32 5, %v371_v13 }
   0xa   :  { %v89_v21 = vsub.s32 2, %v371_v13  ;;  %v93_v22 = vsub.s32 6, %v371_v13  ;;  %p317_p3 = por %p316_p2, %p315_p1 }
   0xb   :  { %286 = vset.pattern.permute.xlu1 %v336_v5  ;;  %287 = vset.pattern.permute.xlu0 %v337_v6  ;;  %v26_v23 = vrot.slane %v15_v20, %v25_v15  ;;  %v30_v24 = vrot.slane %v15_v20, %v29_v16  ;;  %v50_v27 = vrot.slane %v15_v20, %v49_v18 }
   0xc   :  { %120 = vperm.xlu1 %286, %v16_v0   ;;  %126 = vperm.xlu0 %287, %v16_v0   ;;  %v54_v28 = vrot.slane %v15_v20, %v53_v19  ;;  %v90_v29 = vrot.slane %v15_v20, %v89_v21  ;;  %v94_v30 = vrot.slane %v15_v20, %v93_v22  ;;  %p318_p4 = pnand %p317_p3, %p311_p0 }
   0xd   :  { %v36_v31 = vrot.slane %v26_v23, %v25_v15  ;;  %v40_v32 = vrot.slane %v30_v24, %v25_v15  ;;  %v60_v33 = vrot.slane %v50_v27, %v49_v18 }
   0xe   :  { %v64_v34 = vrot.slane %v54_v28, %v49_v18  ;;  %v100_v37 = vrot.slane %v90_v29, %v89_v21  ;;  %v104_v38 = vrot.slane %v94_v30, %v89_v21 }
  0x10   :  { %288 = vset.pattern.permute.xlu1 %v338_v7  ;;  %290 = vset.pattern.permute.xlu0 %v339_v8 }
  0x11   :  { %70 = vperm.xlu1 %288, %v16_v0   ;;  %134 = vperm.xlu0 %290, %v16_v0  }
  0x15   :  { %289 = vset.pattern.permute.xlu1 %v340_v9  ;;  %293 = vset.pattern.permute.xlu0 %v333_v2 }
  0x16   :  { %110 = vperm.xlu1 %289, %v16_v0   ;;  %170 = vperm.xlu0 %293, %v159_v10  }
  0x1a   :  { %291 = vset.pattern.permute.xlu1 %v341_v11  ;;  %296 = vset.pattern.permute.xlu0 %v335_v4 }
  0x1b   :  { %144 = vperm.xlu1 %291, %v16_v0   ;;  %194 = vperm.xlu0 %296, %v159_v10  }
  0x1f   :  { %292 = vset.pattern.permute.xlu1 %v336_v5  ;;  %299 = vset.pattern.permute.xlu0 %v338_v7 }
  0x20   :  { %164 = vperm.xlu1 %292, %v159_v10   ;;  %218 = vperm.xlu0 %299, %v159_v10  }
  0x24   :  { %294 = vset.pattern.permute.xlu1 %v332_v1  ;;  %301 = vset.pattern.permute.xlu0 %v340_v9 }
  0x25   :  { %178 = vperm.xlu1 %294, %v159_v10  }
  0x29   :  { %295 = vset.pattern.permute.xlu1 %v337_v6 }
  0x2a   :  { %188 = vperm.xlu1 %295, %v159_v10  }
  0x2e   :  { %297 = vset.pattern.permute.xlu1 %v334_v3 }
  0x2f   :  { %202 = vperm.xlu1 %297, %v159_v10  }
  0x33   :  { %298 = vset.pattern.permute.xlu1 %v339_v8 }
  0x34   :  { %212 = vperm.xlu1 %298, %v159_v10  }
  0x38   :  { %300 = vset.pattern.permute.xlu1 %v340_v9 }
  0x39   :  { %226 = vperm.xlu1 %300, %v159_v10  }
  0x7d   :  { %v79_v14 = vpop.permute.xlu1 %78  ;;  %v20_v17 = vpop.permute.xlu0 %19 }
  0x7e   :  { %v41_v39 = vmul.f32 %v36_v31, %v20_v17  ;;  %v42_v40 = vmul.f32 %v40_v32, %v20_v17  ;;  %v81_v50 = vmul.f32 %v79_v14, %v60_v33  ;;  %v82_v51 = vmul.f32 %v79_v14, %v64_v34 }
  0x82   :  { %v85_v25 = vpop.permute.xlu1 %84  ;;  %v45_v26 = vpop.permute.xlu0 %44 }
  0x83   :  { %v65_v41 = vmul.f32 %v60_v33, %v45_v26  ;;  %v66_v42 = vmul.f32 %v64_v34, %v45_v26  ;;  %v105_v47 = vmul.f32 %v100_v37, %v85_v25  ;;  %v106_v48 = vmul.f32 %v104_v38, %v85_v25 }
  0x85   :  { %v67_v52 = vadd.f32 %v65_v41, %v41_v39  ;;  %v68_v53 = vadd.f32 %v66_v42, %v42_v40  ;;  %v107_v59 = vadd.f32 %v105_v47, %v81_v50  ;;  %v108_v60 = vadd.f32 %v106_v48, %v82_v51 }
  0x87   :  { %v121_v35 = vpop.permute.xlu1 %120  ;;  %v127_v36 = vpop.permute.xlu0 %126 }
  0x88   :  { %v123_v43 = vmul.f32 %v121_v35, %v100_v37  ;;  %v124_v44 = vmul.f32 %v121_v35, %v104_v38  ;;  %v129_v45 = vmul.f32 %v127_v36, %v36_v31  ;;  %v130_v46 = vmul.f32 %v127_v36, %v40_v32 }
  0x8a   :  { %v131_v54 = vadd.f32 %v129_v45, %v123_v43  ;;  %v132_v55 = vadd.f32 %v130_v46, %v124_v44 }
  0x8c   :  { %v71_v49 = vpop.permute.xlu1 %70  ;;  %v135_v56 = vpop.permute.xlu0 %134 }
  0x8d   :  { %v73_v57 = vadd.f32 %v71_v49, %v67_v52  ;;  %v74_v58 = vadd.f32 %v71_v49, %v68_v53  ;;  %v137_v62 = vadd.f32 %v135_v56, %v131_v54  ;;  %v138_v63 = vadd.f32 %v135_v56, %v132_v55 }
  0x8f   :  { %v75_v2 = vmul.f32 %v73_v57, %v36_v31  ;;  %v76_v3 = vmul.f32 %v74_v58, %v40_v32  ;;  %v139_v6 = vmul.f32 %v137_v62, %v100_v37  ;;  %v140_v7 = vmul.f32 %v138_v63, %v104_v38 }
  0x91   :  { %v111_v61 = vpop.permute.xlu1 %110  ;;  %v171_v30 = vpop.permute.xlu0 %170 }
  0x92   :  { %v113_v0 = vadd.f32 %v111_v61, %v107_v59  ;;  %v114_v1 = vadd.f32 %v111_v61, %v108_v60  ;;  %v342_v61 = vmov 1966171168  }
  0x93   :  { %v237_v62 = vunpack.c.l.s4 %v342_v61 }
  0x94   :  { %v115_v4 = vmul.f32 %v113_v0, %v60_v33  ;;  %v116_v5 = vmul.f32 %v114_v1, %v64_v34 }
  0x96   :  { %v117_v8 = vadd.f32 %v115_v4, %v75_v2  ;;  %v118_v9 = vadd.f32 %v116_v5, %v76_v3  ;;  %v145_v10 = vpop.permute.xlu1 %144  ;;  %v195_v45 = vpop.permute.xlu0 %194  ;;  %v238_v4 = vunpack.c.0.s8 %v237_v62 }
  0x98   :  { %v141_v11 = vadd.f32 %v139_v6, %v117_v8  ;;  %v142_v14 = vadd.f32 %v140_v7, %v118_v9 }
  0x9a   :  { %v147_v15 = vadd.f32 %v145_v10, %v141_v11  ;;  %v148_v16 = vadd.f32 %v145_v10, %v142_v14  ;;  %v241_v11 = vsub.s32 %v238_v4, %v371_v13 }
  0x9b   :  { %v165_v25 = vpop.permute.xlu1 %164  ;;  %v219_v60 = vpop.permute.xlu0 %218 }
  0x9c   :  { %v149_v17 = vmin.f32 %v147_v15, 60.0  ;;  %v150_v18 = vmin.f32 %v148_v16, 60.0 }
  0x9e   :  { %v151_v19 = vmul.f32 1.442695, %v149_v17  ;;  %v153_v20 = vmul.f32 1.442695, %v150_v18 }
  0xa0   :  { %302 = vpow2.f32 %v151_v19  ;;  %v179_v33 = vpop.permute.xlu1 %178 }
  0xa1   :  { %304 = vpow2.f32 %v153_v20 }
  0xa5   :  { %v189_v40 = vpop.permute.xlu1 %188 }
  0xaa   :  { %v203_v48 = vpop.permute.xlu1 %202 }
  0xad   :  { %v303_v21 = vpop.eup %302 }
  0xae   :  { %v305_v22 = vpop.eup %304  ;;  %v155_v23 = vadd.f32 1.0, %v303_v21 }
  0xaf   :  { %v156_v24 = vadd.f32 1.0, %v305_v22  ;;  %v213_v55 = vpop.permute.xlu1 %212 }
  0xb0   :  { %306 = vrcp.f32 %v155_v23 }
  0xb1   :  { %308 = vrcp.f32 %v156_v24 }
  0xb4   :  { %v227_v1 = vpop.permute.xlu1 %226 }
  0xbd   :  { %v307_v26 = vpop.eup %306 }
  0xbe   :  { %v309_v27 = vpop.eup %308  ;;  %v160_v28 = vrot.slane %v307_v26, 1 }
  0xbf   :  { %v161_v29 = vrot.slane %v309_v27, 1 }
  0xc0   :  { %v167_v31 = vmul.f32 %v165_v25, %v160_v28  ;;  %v181_v36 = vmul.f32 %v179_v33, %v160_v28 }
  0xc1   :  { %v168_v32 = vmul.f32 %v165_v25, %v161_v29  ;;  %v182_v38 = vmul.f32 %v179_v33, %v161_v29 }
  0xc2   :  { %v173_v34 = vadd.f32 %v171_v30, %v167_v31 }
  0xc3   :  { %v174_v35 = vadd.f32 %v171_v30, %v168_v32 }
  0xc4   :  { %v175_v37 = vmul.f32 %v307_v26, %v173_v34 }
  0xc5   :  { %v176_v39 = vmul.f32 %v309_v27, %v174_v35 }
  0xc6   :  { %v183_v41 = vadd.f32 %v181_v36, %v175_v37 }
  0xc7   :  { %v184_v42 = vadd.f32 %v182_v38, %v176_v39 }
  0xc8   :  { %v185_v43 = vrot.slane %v183_v41, 2 }
  0xc9   :  { %v186_v44 = vrot.slane %v184_v42, 2 }
  0xca   :  { %v191_v46 = vmul.f32 %v189_v40, %v185_v43  ;;  %v205_v51 = vmul.f32 %v203_v48, %v185_v43 }
  0xcb   :  { %v192_v47 = vmul.f32 %v189_v40, %v186_v44  ;;  %v206_v53 = vmul.f32 %v203_v48, %v186_v44 }
  0xcc   :  { %v197_v49 = vadd.f32 %v195_v45, %v191_v46 }
  0xcd   :  { %v198_v50 = vadd.f32 %v195_v45, %v192_v47 }
  0xce   :  { %v199_v52 = vmul.f32 %v197_v49, %v183_v41 }
  0xcf   :  { %v200_v54 = vmul.f32 %v198_v50, %v184_v42 }
  0xd0   :  { %v207_v56 = vadd.f32 %v205_v51, %v199_v52 }
  0xd1   :  { %v208_v57 = vadd.f32 %v206_v53, %v200_v54 }
  0xd2   :  { %v209_v58 = vrot.slane %v207_v56, 4 }
  0xd3   :  { %v210_v59 = vrot.slane %v208_v57, 4 }
  0xd4   :  { %v215_v63 = vmul.f32 %v213_v55, %v209_v58  ;;  %v229_v5 = vmul.f32 %v227_v1, %v209_v58 }
  0xd5   :  { %v216_v0 = vmul.f32 %v213_v55, %v210_v59  ;;  %v230_v7 = vmul.f32 %v227_v1, %v210_v59 }
  0xd6   :  { %v221_v2 = vadd.f32 %v219_v60, %v215_v63 }
  0xd7   :  { %v222_v3 = vadd.f32 %v219_v60, %v216_v0 }
  0xd8   :  { %v223_v6 = vmul.f32 %v221_v2, %v207_v56 }
  0xd9   :  { %v224_v8 = vmul.f32 %v222_v3, %v208_v57 }
  0xda   :  { %v231_v9 = vadd.f32 %v229_v5, %v223_v6 }
  0xdb   :  { %v232_v10 = vadd.f32 %v230_v7, %v224_v8 }
  0xdd   :  { %v235_v14 = vcombine.low %v231_v9, %v232_v10 }
  0xdf   :  { %v242_v15 = vrot.slane %v235_v14, %v241_v11 }
  0xe1   :  { %v249_v16 = vrot.slane %v242_v15, %v241_v11 }
  0xe3   :  { %255 = vst.msk [vmem:[#allocation2] sm:$0x3] %vm253_vm0, %v249_v16 }
  0xe4   :  { %321 = shalt.err (!%p318_p4)
}
  0xe5   :  { %265 = dma.vmem_to_hbm [thread:$0]  %s263_s16, 32, %s390_s3, [#allocation3]  }
  0xe6   :  { %330 = dma.done.wait [#allocation3], 32  }
  0xe7   :  { %331 = vsyncadd [#allocation3], 4294967264 }
  0xe8   :  { %269 = vsyncpa [#allocation3], 1 }

</bundles_post_ra>
